<compile_context>
chip_gen: v7x
topology: tpu7x:2x2x1
jax: 0.10.0
libtpu: 0.0.40
codegen_flags: <defaults>
</compile_context>

<pallas_src>
import jax
import jax.numpy as jnp
from jax.experimental import pallas as pl
from jax.experimental.pallas import tpu as pltpu


def _leaky_relu(x, negative_slope=0.01):
    # matches torch.nn.functional.leaky_relu default slope
    return jnp.where(x > 0, x, negative_slope * x)


def indelnet_kernel(x_ref, wh_ref, bh_ref, wp_ref, bp_ref, o_ref):
    """Batch-on-lanes fused MLP.

    x_ref : (F, TB)        bf16   activations, batch on the lane axis
    wh_ref: (L, H, H)      bf16   hidden weights, torch (out, in) layout
    bh_ref: (L, H, 1)      f32    hidden biases (broadcast over lanes)
    wp_ref: (OUT_PAD, H)   bf16   projection weight (zero-padded rows)
    bp_ref: (OUT_PAD, 1)   f32    projection bias
    o_ref : (OUT_PAD, TB)  f32
    """
    h = x_ref[...]                                   # bf16, (F, TB)
    num_hidden = wh_ref.shape[0]
    for i in range(num_hidden):                      # statically unrolled
        z = jnp.dot(wh_ref[i], h,
                    preferred_element_type=jnp.float32) + bh_ref[i]
        z = _leaky_relu(z)                           # f32 elementwise
        # dropout(p=0.5) -> identity (eval mode)
        h = z.astype(jnp.bfloat16)                   # bf16 MXU operand
    out = jnp.dot(wp_ref[...], h,
                  preferred_element_type=jnp.float32) + bp_ref[...]
    o_ref[...] = out.astype(o_ref.dtype)


def prepare_params(params):
    """One-time packing of layer params into kernel operands (call once, reuse).

    params: list of (W, b) with W (in, out) and b (1, out) f32; last entry is
    the projection layer.  Requires n_features == hidden_sizes[i] (true for
    this model config) so the 5 hidden weights stack into one (5, H, H) array.
    """
    hidden = params[:-1]
    wp, bp = params[-1]
    F, H = hidden[0][0].shape
    n_output = wp.shape[1]
    assert F == H and all(w.shape == (H, H) for w, _ in hidden), \
        "stacked-weight fast path needs n_features == hidden_sizes[i]"

    # torch (out, in) layout so the kernel computes W @ h with batch on lanes
    wh = jnp.stack([w.T for w, _ in hidden]).astype(jnp.bfloat16)        # (L,H,H)
    bh = jnp.stack([b.reshape(-1, 1) for _, b in hidden]).astype(jnp.float32)  # (L,H,1)

    out_pad = max(8, ((n_output + 7) // 8) * 8)      # sublane-align projection
    wp_p = jnp.zeros((out_pad, H), jnp.bfloat16).at[:n_output, :].set(
        wp.T.astype(jnp.bfloat16))
    bp_p = jnp.zeros((out_pad, 1), jnp.float32).at[:n_output, :].set(
        bp.reshape(-1, 1).astype(jnp.float32))

    return {"wh": wh, "bh": bh, "wp": wp_p, "bp": bp_p,
            "n_features": F, "n_output": n_output}


def indelnet_forward(x, packed, *, max_batch_tile=2048):
    """x: (B, n_features) f32.  packed: output of prepare_params()."""
    B, F = x.shape
    assert F == packed["n_features"]
    wh, bh, wp_p, bp_p = packed["wh"], packed["bh"], packed["wp"], packed["bp"]
    L, H, _ = wh.shape
    out_pad = wp_p.shape[0]
    n_output = packed["n_output"]

    # Batch on lanes: (F, B) bf16, padded to a multiple of the batch tile.
    xt = x.astype(jnp.bfloat16).T
    tb = min(max_batch_tile, ((B + 127) // 128) * 128)   # lane-aligned tile
    b_pad = ((B + tb - 1) // tb) * tb
    if b_pad != B:
        xt = jnp.pad(xt, ((0, 0), (0, b_pad - B)))
    grid = (b_pad // tb,)                                # (1,) for small B

    out = pl.pallas_call(
        indelnet_kernel,
        out_shape=jax.ShapeDtypeStruct((out_pad, b_pad), jnp.float32),
        grid=grid,
        in_specs=[
            pl.BlockSpec((F, tb), lambda i: (0, i)),       # x: one batch tile/step
            pl.BlockSpec((L, H, H), lambda i: (0, 0, 0)),  # weights VMEM-resident
            pl.BlockSpec((L, H, 1), lambda i: (0, 0, 0)),
            pl.BlockSpec((out_pad, H), lambda i: (0, 0)),
            pl.BlockSpec((out_pad, 1), lambda i: (0, 0)),
        ],
        out_specs=pl.BlockSpec((out_pad, tb), lambda i: (0, i)),
        compiler_params=pltpu.CompilerParams(
            dimension_semantics=("parallel",)),
    )(xt, wh, bh, wp_p, bp_p)

    return out[:n_output, :B].T                            # back to (B, n_output)


def init_linear_params(key, in_features, out_features):
    """Deterministic init mimicking torch.nn.Linear default (uniform +-1/sqrt(in)).
    Returns weight as (in, out) and bias as (1, out), f32."""
    kw, kb = jax.random.split(key)
    bound = 1.0 / jnp.sqrt(jnp.float32(in_features))
    w = jax.random.uniform(kw, (in_features, out_features), jnp.float32,
                           minval=-bound, maxval=bound)
    b = jax.random.uniform(kb, (1, out_features), jnp.float32,
                           minval=-bound, maxval=bound)
    return w, b


def reference_forward(x, params):
    """Pure-JAX reference mirroring kernel numerics (bf16 MXU operands, f32
    accumulation and f32 elementwise)."""
    h = x
    n = len(params)
    for i, (w, b) in enumerate(params):
        h = jnp.dot(h.astype(jnp.bfloat16), w.astype(jnp.bfloat16),
                    preferred_element_type=jnp.float32) + b
        if i < n - 1:
            h = _leaky_relu(h)
    return h


if __name__ == "__main__":
    key = jax.random.PRNGKey(0)

    n_features = 32
    hidden_sizes = [32, 32, 32, 32, 32]   # len == 5, as asserted in __init__
    n_output = 4
    batch = 256

    dims = [n_features] + hidden_sizes + [n_output]
    keys = jax.random.split(key, len(dims))  # last key used for x

    params = []
    for i in range(len(dims) - 1):
        params.append(init_linear_params(keys[i], dims[i], dims[i + 1]))

    x = jax.random.normal(keys[-1], (batch, n_features), jnp.float32)

    packed = prepare_params(params)            # one-time weight packing
    out = indelnet_forward(x, packed)
    out = jax.block_until_ready(out)

    ref = reference_forward(x, params)
    assert out.shape == (batch, n_output)
    assert jnp.allclose(out, ref, atol=2e-3, rtol=2e-3), "mismatch vs reference"

    print("KERNEL_OK")
</pallas_src>

<mosaic_0001>
module attributes {stable_mosaic.version = 11 : i64} {
  func.func @indelnet_kernel(%arg0: i32, %arg1: memref<32x256xbf16, #tpu.memory_space<vmem>>, %arg2: memref<5x32x32xbf16, #tpu.memory_space<vmem>>, %arg3: memref<5x32x1xf32, #tpu.memory_space<vmem>>, %arg4: memref<8x32xbf16, #tpu.memory_space<vmem>>, %arg5: memref<8x1xf32, #tpu.memory_space<vmem>>, %arg6: memref<8x256xf32, #tpu.memory_space<vmem>>) attributes {dimension_semantics = [#tpu.dimension_semantics<parallel>], iteration_bounds = array<i64: 1>, scalar_prefetch = 0 : i64, scratch_operands = 0 : i64, tpu.core_type = #tpu.core_type<tc>, window_params = [{transform_indices = @transform_0, window_bounds = array<i64: 32, 256>}, {pipeline_mode = #tpu.pipeline_mode<synchronous>, transform_indices = @transform_1, window_bounds = array<i64: 5, 32, 32>}, {pipeline_mode = #tpu.pipeline_mode<synchronous>, transform_indices = @transform_2, window_bounds = array<i64: 5, 32, 1>}, {pipeline_mode = #tpu.pipeline_mode<synchronous>, transform_indices = @transform_3, window_bounds = array<i64: 8, 32>}, {pipeline_mode = #tpu.pipeline_mode<synchronous>, transform_indices = @transform_4, window_bounds = array<i64: 8, 1>}, {transform_indices = @transform_5, window_bounds = array<i64: 8, 256>}]} {
    %c0 = arith.constant 0 : index
    %c0_0 = arith.constant 0 : index
    %0 = vector.load %arg1[%c0, %c0_0] : memref<32x256xbf16, #tpu.memory_space<vmem>>, vector<32x256xbf16>
    %c0_1 = arith.constant 0 : index
    %c0_2 = arith.constant 0 : index
    %c0_3 = arith.constant 0 : index
    %1 = vector.load %arg2[%c0_1, %c0_2, %c0_3] : memref<5x32x32xbf16, #tpu.memory_space<vmem>>, vector<1x32x32xbf16>
    %2 = vector.shape_cast %1 : vector<1x32x32xbf16> to vector<32x32xbf16>
    %cst = arith.constant dense<0.000000e+00> : vector<32x256xf32>
    %3 = tpu.matmul %2, %0, %cst {dimension_numbers = #tpu.dot_dimension_numbers<[1], [0], [0], [1], [0, 0, 1, 1], [], []>} : vector<32x32xbf16>, vector<32x256xbf16>, vector<32x256xf32> -> vector<32x256xf32>
    %c0_4 = arith.constant 0 : index
    %c0_5 = arith.constant 0 : index
    %c0_6 = arith.constant 0 : index
    %4 = vector.load %arg3[%c0_4, %c0_5, %c0_6] : memref<5x32x1xf32, #tpu.memory_space<vmem>>, vector<1x32x1xf32>
    %5 = vector.shape_cast %4 : vector<1x32x1xf32> to vector<32x1xf32>
    %6 = vector.broadcast %5 : vector<32x1xf32> to vector<32x256xf32>
    %7 = arith.addf %3, %6 : vector<32x256xf32>
    %cst_7 = arith.constant 0.000000e+00 : f32
    %8 = vector.broadcast %cst_7 : f32 to vector<32x256xf32>
    %9 = arith.cmpf ogt, %7, %8 : vector<32x256xf32>
    %cst_8 = arith.constant 0.00999999977 : f32
    %10 = vector.broadcast %cst_8 : f32 to vector<32x256xf32>
    %11 = arith.mulf %10, %7 : vector<32x256xf32>
    %12 = arith.select %9, %7, %11 : vector<32x256xi1>, vector<32x256xf32>
    %13 = arith.truncf %12 : vector<32x256xf32> to vector<32x256xbf16>
    %c1 = arith.constant 1 : index
    %c0_9 = arith.constant 0 : index
    %c0_10 = arith.constant 0 : index
    %14 = vector.load %arg2[%c1, %c0_9, %c0_10] : memref<5x32x32xbf16, #tpu.memory_space<vmem>>, vector<1x32x32xbf16>
    %15 = vector.shape_cast %14 : vector<1x32x32xbf16> to vector<32x32xbf16>
    %cst_11 = arith.constant dense<0.000000e+00> : vector<32x256xf32>
    %16 = tpu.matmul %15, %13, %cst_11 {dimension_numbers = #tpu.dot_dimension_numbers<[1], [0], [0], [1], [0, 0, 1, 1], [], []>} : vector<32x32xbf16>, vector<32x256xbf16>, vector<32x256xf32> -> vector<32x256xf32>
    %c1_12 = arith.constant 1 : index
    %c0_13 = arith.constant 0 : index
    %c0_14 = arith.constant 0 : index
    %17 = vector.load %arg3[%c1_12, %c0_13, %c0_14] : memref<5x32x1xf32, #tpu.memory_space<vmem>>, vector<1x32x1xf32>
    %18 = vector.shape_cast %17 : vector<1x32x1xf32> to vector<32x1xf32>
    %19 = vector.broadcast %18 : vector<32x1xf32> to vector<32x256xf32>
    %20 = arith.addf %16, %19 : vector<32x256xf32>
    %cst_15 = arith.constant 0.000000e+00 : f32
    %21 = vector.broadcast %cst_15 : f32 to vector<32x256xf32>
    %22 = arith.cmpf ogt, %20, %21 : vector<32x256xf32>
    %cst_16 = arith.constant 0.00999999977 : f32
    %23 = vector.broadcast %cst_16 : f32 to vector<32x256xf32>
    %24 = arith.mulf %23, %20 : vector<32x256xf32>
    %25 = arith.select %22, %20, %24 : vector<32x256xi1>, vector<32x256xf32>
    %26 = arith.truncf %25 : vector<32x256xf32> to vector<32x256xbf16>
    %c2 = arith.constant 2 : index
    %c0_17 = arith.constant 0 : index
    %c0_18 = arith.constant 0 : index
    %27 = vector.load %arg2[%c2, %c0_17, %c0_18] : memref<5x32x32xbf16, #tpu.memory_space<vmem>>, vector<1x32x32xbf16>
    %28 = vector.shape_cast %27 : vector<1x32x32xbf16> to vector<32x32xbf16>
    %cst_19 = arith.constant dense<0.000000e+00> : vector<32x256xf32>
    %29 = tpu.matmul %28, %26, %cst_19 {dimension_numbers = #tpu.dot_dimension_numbers<[1], [0], [0], [1], [0, 0, 1, 1], [], []>} : vector<32x32xbf16>, vector<32x256xbf16>, vector<32x256xf32> -> vector<32x256xf32>
    %c2_20 = arith.constant 2 : index
    %c0_21 = arith.constant 0 : index
    %c0_22 = arith.constant 0 : index
    %30 = vector.load %arg3[%c2_20, %c0_21, %c0_22] : memref<5x32x1xf32, #tpu.memory_space<vmem>>, vector<1x32x1xf32>
    %31 = vector.shape_cast %30 : vector<1x32x1xf32> to vector<32x1xf32>
    %32 = vector.broadcast %31 : vector<32x1xf32> to vector<32x256xf32>
    %33 = arith.addf %29, %32 : vector<32x256xf32>
    %cst_23 = arith.constant 0.000000e+00 : f32
    %34 = vector.broadcast %cst_23 : f32 to vector<32x256xf32>
    %35 = arith.cmpf ogt, %33, %34 : vector<32x256xf32>
    %cst_24 = arith.constant 0.00999999977 : f32
    %36 = vector.broadcast %cst_24 : f32 to vector<32x256xf32>
    %37 = arith.mulf %36, %33 : vector<32x256xf32>
    %38 = arith.select %35, %33, %37 : vector<32x256xi1>, vector<32x256xf32>
    %39 = arith.truncf %38 : vector<32x256xf32> to vector<32x256xbf16>
    %c3 = arith.constant 3 : index
    %c0_25 = arith.constant 0 : index
    %c0_26 = arith.constant 0 : index
    %40 = vector.load %arg2[%c3, %c0_25, %c0_26] : memref<5x32x32xbf16, #tpu.memory_space<vmem>>, vector<1x32x32xbf16>
    %41 = vector.shape_cast %40 : vector<1x32x32xbf16> to vector<32x32xbf16>
    %cst_27 = arith.constant dense<0.000000e+00> : vector<32x256xf32>
    %42 = tpu.matmul %41, %39, %cst_27 {dimension_numbers = #tpu.dot_dimension_numbers<[1], [0], [0], [1], [0, 0, 1, 1], [], []>} : vector<32x32xbf16>, vector<32x256xbf16>, vector<32x256xf32> -> vector<32x256xf32>
    %c3_28 = arith.constant 3 : index
    %c0_29 = arith.constant 0 : index
    %c0_30 = arith.constant 0 : index
    %43 = vector.load %arg3[%c3_28, %c0_29, %c0_30] : memref<5x32x1xf32, #tpu.memory_space<vmem>>, vector<1x32x1xf32>
    %44 = vector.shape_cast %43 : vector<1x32x1xf32> to vector<32x1xf32>
    %45 = vector.broadcast %44 : vector<32x1xf32> to vector<32x256xf32>
    %46 = arith.addf %42, %45 : vector<32x256xf32>
    %cst_31 = arith.constant 0.000000e+00 : f32
    %47 = vector.broadcast %cst_31 : f32 to vector<32x256xf32>
    %48 = arith.cmpf ogt, %46, %47 : vector<32x256xf32>
    %cst_32 = arith.constant 0.00999999977 : f32
    %49 = vector.broadcast %cst_32 : f32 to vector<32x256xf32>
    %50 = arith.mulf %49, %46 : vector<32x256xf32>
    %51 = arith.select %48, %46, %50 : vector<32x256xi1>, vector<32x256xf32>
    %52 = arith.truncf %51 : vector<32x256xf32> to vector<32x256xbf16>
    %c4 = arith.constant 4 : index
    %c0_33 = arith.constant 0 : index
    %c0_34 = arith.constant 0 : index
    %53 = vector.load %arg2[%c4, %c0_33, %c0_34] : memref<5x32x32xbf16, #tpu.memory_space<vmem>>, vector<1x32x32xbf16>
    %54 = vector.shape_cast %53 : vector<1x32x32xbf16> to vector<32x32xbf16>
    %cst_35 = arith.constant dense<0.000000e+00> : vector<32x256xf32>
    %55 = tpu.matmul %54, %52, %cst_35 {dimension_numbers = #tpu.dot_dimension_numbers<[1], [0], [0], [1], [0, 0, 1, 1], [], []>} : vector<32x32xbf16>, vector<32x256xbf16>, vector<32x256xf32> -> vector<32x256xf32>
    %c4_36 = arith.constant 4 : index
    %c0_37 = arith.constant 0 : index
    %c0_38 = arith.constant 0 : index
    %56 = vector.load %arg3[%c4_36, %c0_37, %c0_38] : memref<5x32x1xf32, #tpu.memory_space<vmem>>, vector<1x32x1xf32>
    %57 = vector.shape_cast %56 : vector<1x32x1xf32> to vector<32x1xf32>
    %58 = vector.broadcast %57 : vector<32x1xf32> to vector<32x256xf32>
    %59 = arith.addf %55, %58 : vector<32x256xf32>
    %cst_39 = arith.constant 0.000000e+00 : f32
    %60 = vector.broadcast %cst_39 : f32 to vector<32x256xf32>
    %61 = arith.cmpf ogt, %59, %60 : vector<32x256xf32>
    %cst_40 = arith.constant 0.00999999977 : f32
    %62 = vector.broadcast %cst_40 : f32 to vector<32x256xf32>
    %63 = arith.mulf %62, %59 : vector<32x256xf32>
    %64 = arith.select %61, %59, %63 : vector<32x256xi1>, vector<32x256xf32>
    %65 = arith.truncf %64 : vector<32x256xf32> to vector<32x256xbf16>
    %c0_41 = arith.constant 0 : index
    %c0_42 = arith.constant 0 : index
    %66 = vector.load %arg4[%c0_41, %c0_42] : memref<8x32xbf16, #tpu.memory_space<vmem>>, vector<8x32xbf16>
    %cst_43 = arith.constant dense<0.000000e+00> : vector<8x256xf32>
    %67 = tpu.matmul %66, %65, %cst_43 {dimension_numbers = #tpu.dot_dimension_numbers<[1], [0], [0], [1], [0, 0, 1, 1], [], []>} : vector<8x32xbf16>, vector<32x256xbf16>, vector<8x256xf32> -> vector<8x256xf32>
    %c0_44 = arith.constant 0 : index
    %c0_45 = arith.constant 0 : index
    %68 = vector.load %arg5[%c0_44, %c0_45] : memref<8x1xf32, #tpu.memory_space<vmem>>, vector<8x1xf32>
    %69 = vector.broadcast %68 : vector<8x1xf32> to vector<8x256xf32>
    %70 = arith.addf %67, %69 : vector<8x256xf32>
    %c0_46 = arith.constant 0 : index
    %c0_47 = arith.constant 0 : index
    %71 = vector.load %arg6[%c0_46, %c0_47] : memref<8x256xf32, #tpu.memory_space<vmem>>, vector<8x256xf32>
    tpu.vector_store %arg6[%c0_46, %c0_47], %70 {strides = array<i32>} : memref<8x256xf32, #tpu.memory_space<vmem>>, vector<8x256xf32>,
    return
  }
  func.func @transform_0(%arg0: i32) -> (i32, i32) {
    %c0_i32 = arith.constant 0 : i32
    %c0_i32_0 = arith.constant 0 : i32
    return %c0_i32, %arg0 : i32, i32
  }
  func.func @transform_1(%arg0: i32) -> (i32, i32, i32) {
    %c0_i32 = arith.constant 0 : i32
    %c0_i32_0 = arith.constant 0 : i32
    %c0_i32_1 = arith.constant 0 : i32
    %c0_i32_2 = arith.constant 0 : i32
    return %c0_i32, %c0_i32_0, %c0_i32_1 : i32, i32, i32
  }
  func.func @transform_2(%arg0: i32) -> (i32, i32, i32) {
    %c0_i32 = arith.constant 0 : i32
    %c0_i32_0 = arith.constant 0 : i32
    %c0_i32_1 = arith.constant 0 : i32
    %c0_i32_2 = arith.constant 0 : i32
    return %c0_i32, %c0_i32_0, %c0_i32_1 : i32, i32, i32
  }
  func.func @transform_3(%arg0: i32) -> (i32, i32) {
    %c0_i32 = arith.constant 0 : i32
    %c0_i32_0 = arith.constant 0 : i32
    %c0_i32_1 = arith.constant 0 : i32
    return %c0_i32, %c0_i32_0 : i32, i32
  }
  func.func @transform_4(%arg0: i32) -> (i32, i32) {
    %c0_i32 = arith.constant 0 : i32
    %c0_i32_0 = arith.constant 0 : i32
    %c0_i32_1 = arith.constant 0 : i32
    return %c0_i32, %c0_i32_0 : i32, i32
  }
  func.func @transform_5(%arg0: i32) -> (i32, i32) {
    %c0_i32 = arith.constant 0 : i32
    %c0_i32_0 = arith.constant 0 : i32
    return %c0_i32, %arg0 : i32, i32
  }
}

</mosaic_0001>

<bundles_post_ra>
// kernel: tpu_custom_call.1
= control target key start
LH: loop header
LB: loop body
LE: loop exit
PB: predicated region body
PF: predicated region fallthrough
CT: control target
= control target key end

     0   :  { %v848_v2 = vmov 0   ;;  %vm84_vm0 = vcmask 261120   ;;  %s1024_s0 = inlined_call_operand.vmem [shape: bf16[32,256], index: 0, kind: input, shape index: {}]   ;;  %s1025_s1 = inlined_call_operand.vmem [shape: bf16[5,32,32], index: 1, kind: input, shape index: {}]   ;;  %s1026_s2 = inlined_call_operand.vmem [shape: f32[5,32,1], index: 2, kind: input, shape index: {}]   ;;  %s1027_s3 = inlined_call_operand.vmem [shape: bf16[8,32], index: 3, kind: input, shape index: {}]   ;;  %s1028_s4 = inlined_call_operand.vmem [shape: f32[8,1], index: 4, kind: input, shape index: {}]   ;;  %s1029_s5 = inlined_call_operand.hbm [shape: f32[8,256], index: 5, kind: output, shape index: {}]  }
   0x1   :  { %v808_v0 = vld [vmem:[%s1024_s0 + $0x4] ss:$8 sps:$4 sm:$0xff]   ;;  %v810_v1 = vld [vmem:[%s1024_s0] ss:$8 sps:$4 sm:$0xff]   ;;  %123 = vmatprep.mubr.bf16.mxu0 %v848_v2  ;;  %806 = vset.pattern.permute.xlu0 %v848_v2  ;;  %v811_v3 = vld [vmem:[%s1024_s0 + $0x14] ss:$8 sps:$4 sm:$0xff]  }
   0x2   :  { %91 = vmatprep.subr.bf16.mxu0 %v808_v0  ;;  %807 = vset.pattern.permute.xlu1 %v848_v2  ;;  %v813_v4 = vld [vmem:[%s1024_s0 + $0x10] ss:$8 sps:$4 sm:$0xff]   ;;  %v30_v5 = vld [vmem:[%s1026_s2] sm:$0xff]  ;;  %v31_v8 = vld [vmem:[%s1026_s2 + $0x8] sm:$0xff] }
   0x3   :  { %92 = vmatpush1.bf16.msra.mxu0 %v810_v1  ;;  %250 = vmatprep.mubr.bf16.mxu1 %v848_v2  ;;  %v32_v6 = vld [vmem:[%s1026_s2 + $0x10] sm:$0xff]  ;;  %v814_v7 = vld [vmem:[%s1025_s1] sm:$0xff]   ;;  %v33_v9 = vld [vmem:[%s1026_s2 + $0x18] sm:$0xff] }
   0x4   :  { %93 = vmatprep.subr.bf16.mxu0 %v811_v3  ;;  %36 = vperm.xlu0 %806, %v30_v5   ;;  %v759_v10 = vld [vmem:[%s1026_s2 + $0x20] sm:$0xff]  ;;  %v760_v11 = vld [vmem:[%s1026_s2 + $0x28] sm:$0xff]  ;;  %v761_v13 = vld [vmem:[%s1026_s2 + $0x30] sm:$0xff] }
   0x5   :  { %46 = vperm.xlu1 %807, %v32_v6   ;;  %v815_v12 = vld [vmem:[%s1025_s1 + $0x8] sm:$0xff]   ;;  %v762_v14 = vld [vmem:[%s1026_s2 + $0x38] sm:$0xff] }
   0x7   :  { %94 = vmatpush1.bf16.msra.mxu0 %v813_v4 }
   0x8   :  { %41 = vperm.xlu0 %806, %v31_v8  }
   0x9   :  { %51 = vperm.xlu1 %807, %v33_v9  }
   0xa   :  { %753 = vmatmul.mubr.msk.bf16.vlgmr.msra.gmra.mrb[0].mxu0 %vm84_vm0, %v814_v7 }
   0xb   :  { %133 = vmatprep.mubr.bf16.mxu0 %v848_v2 }
   0xc   :  { %184 = vperm.xlu0 %806, %v759_v10  }
   0xd   :  { %189 = vperm.xlu1 %807, %v760_v11  }
  0x10   :  { %194 = vperm.xlu0 %806, %v761_v13  }
  0x11   :  { %10 = vsyncpa [#allocation3], 0  ;;  %v771_v15 = vld [vmem:[%s1026_s2 + $0x40] sm:$0xff]  ;;  %199 = vperm.xlu1 %807, %v762_v14   ;;  %v772_v16 = vld [vmem:[%s1026_s2 + $0x48] sm:$0xff]  ;;  %s849_s9 = smov [#allocation2]  }
  0x12   :  { %754 = vmatmul.mubr.msk.bf16.gmra.mrb[4].mxu0 %vm84_vm0, %v815_v12  ;;  %v773_v17 = vld [vmem:[%s1026_s2 + $0x50] sm:$0xff]  ;;  %v774_v18 = vld [vmem:[%s1026_s2 + $0x58] sm:$0xff]  ;;  %v783_v19 = vld [vmem:[%s1026_s2 + $0x60] sm:$0xff]  ;;  %s739_s10 = sshll.u32 %s849_s9, 4  ;;  %s740_s10 = int_to_ptr.vmem [resolvable:$true] %s739_s10 }
  0x13   :  { %377 = vmatprep.mubr.bf16.mxu0 %v848_v2  ;;  %v784_v20 = vld [vmem:[%s1026_s2 + $0x68] sm:$0xff]  ;;  %v785_v21 = vld [vmem:[%s1026_s2 + $0x70] sm:$0xff]  ;;  %v786_v22 = vld [vmem:[%s1026_s2 + $0x78] sm:$0xff]  ;;  %s824_s11 = scalar_lea.vmem %s740_s10, 256  ;;  %p829_p1 = scmp.lt.s32.totalorder %s740_s10, %s740_s10 }
  0x14   :  { %311 = vperm.xlu0 %806, %v771_v15   ;;  %v795_v23 = vld [vmem:[%s1026_s2 + $0x80] sm:$0xff]  ;;  %v796_v24 = vld [vmem:[%s1026_s2 + $0x88] sm:$0xff]  ;;  %v797_v25 = vld [vmem:[%s1026_s2 + $0x90] sm:$0xff]  ;;  %p825_p0 = scmp.ne.s32.totalorder %s740_s10, %s824_s11  ;;  %p830_p2 = scmp.lt.s32.totalorder %s824_s11, %s824_s11 }
  0x15   :  { %316 = vperm.xlu1 %807, %v772_v16   ;;  %v798_v26 = vld [vmem:[%s1026_s2 + $0x98] sm:$0xff]  ;;  %v681_v27 = vld [vmem:[%s1028_s4] sm:$0xff]  ;;  %v816_v5 = vld [vmem:[%s1025_s1 + $0x10] sm:$0xff]  }
  0x16   :  { %v817_v6 = vld [vmem:[%s1025_s1 + $0x18] sm:$0xff]   ;;  %p831_p3 = por %p830_p2, %p829_p1 }
  0x18   :  { %321 = vperm.xlu0 %806, %v773_v17   ;;  %p832_p4 = pnand %p831_p3, %p825_p0 }
  0x19   :  { %326 = vperm.xlu1 %807, %v774_v18  }
  0x1c   :  { %438 = vperm.xlu0 %806, %v783_v19  }
  0x1d   :  { %443 = vperm.xlu1 %807, %v784_v20  }
  0x20   :  { %448 = vperm.xlu0 %806, %v785_v21  }
  0x21   :  { %453 = vperm.xlu1 %807, %v786_v22  }
  0x24   :  { %565 = vperm.xlu0 %806, %v795_v23  }
  0x25   :  { %570 = vperm.xlu1 %807, %v796_v24  }
  0x28   :  { %575 = vperm.xlu0 %806, %v797_v25  }
  0x29   :  { %580 = vperm.xlu1 %807, %v798_v26  }
  0x2c   :  { %684 = vperm.xlu0 %806, %v681_v27  }
  0x83   :  { %v37_v28 = vpop.permute.xlu0 %36 }
  0x84   :  { %v47_v38 = vpop.permute.xlu1 %46 }
  0x87   :  { %v42_v32 = vpop.permute.xlu0 %41 }
  0x88   :  { %v52_v52 = vpop.permute.xlu1 %51 }
  0x8b   :  { %v185_v7 = vpop.permute.xlu0 %184 }
  0x8c   :  { %v190_v11 = vpop.permute.xlu1 %189 }
  0x8f   :  { %v195_v23 = vpop.permute.xlu0 %194 }
  0xdd   :  { %v125_v29 = vpop.f32.mrb[0].mxu0 }
  0xde   :  { %v126_v30 = vadd.f32 %v125_v29, %v37_v28  ;;  %v127_v31 = vpop.f32.mrb[1].mxu0 }
  0xdf   :  { %v128_v33 = vadd.f32 %v127_v31, %v37_v28  ;;  %v129_v34 = vpop.f32.mrb[2].mxu0  ;;  %v200_v31 = vpop.permute.xlu1 %199 }
  0xe0   :  { %v152_v35 = vmul.f32 0.01, %v126_v30  ;;  %v130_v36 = vadd.f32 %v129_v34, %v42_v32  ;;  %v131_v37 = vpop.f32.mrb[3].mxu0  ;;  %vm144_vm1 = vcmp.gt.f32.partialorder %v126_v30, 0.0 }
  0xe1   :  { %v153_v39 = vmul.f32 0.01, %v128_v33  ;;  %v132_v40 = vadd.f32 %v131_v37, %v42_v32  ;;  %vm145_vm2 = vcmp.gt.f32.partialorder %v128_v33, 0.0 }
  0xe2   :  { %v154_v41 = vmul.f32 0.01, %v130_v36  ;;  %vm146_vm3 = vcmp.gt.f32.partialorder %v130_v36, 0.0  ;;  %v160_v43 = vsel %vm144_vm1, %v126_v30, %v152_v35 }
  0xe3   :  { %v155_v42 = vmul.f32 0.01, %v132_v40  ;;  %vm147_vm4 = vcmp.gt.f32.partialorder %v132_v40, 0.0  ;;  %v161_v46 = vsel %vm145_vm2, %v128_v33, %v153_v39 }
  0xe4   :  { %v162_v44 = vsel %vm146_vm3, %v130_v36, %v154_v41 }
  0xe5   :  { %v135_v45 = vpop.f32.mrb[4].mxu0  ;;  %v163_v47 = vsel %vm147_vm4, %v132_v40, %v155_v42  ;;  %v168_v48 = vpack.c.bf16 %v162_v44, %v160_v43 }
  0xe6   :  { %v136_v49 = vadd.f32 %v135_v45, %v47_v38  ;;  %v137_v50 = vpop.f32.mrb[5].mxu0  ;;  %v169_v51 = vpack.c.bf16 %v163_v47, %v161_v46  ;;  %v818_v47 = vld [vmem:[%s1025_s1 + $0x20] sm:$0xff]  }
  0xe7   :  { %v138_v53 = vadd.f32 %v137_v50, %v47_v38  ;;  %v139_v54 = vpop.f32.mrb[6].mxu0 }
  0xe8   :  { %v156_v55 = vmul.f32 0.01, %v136_v49  ;;  %v140_v56 = vadd.f32 %v139_v54, %v52_v52  ;;  %v141_v57 = vpop.f32.mrb[7].mxu0  ;;  %218 = vmatprep.subr.bf16.mxu1 %v169_v51  ;;  %vm148_vm5 = vcmp.gt.f32.partialorder %v136_v49, 0.0 }
  0xe9   :  { %v157_v58 = vmul.f32 0.01, %v138_v53  ;;  %v142_v59 = vadd.f32 %v141_v57, %v52_v52  ;;  %219 = vmatpush1.bf16.msra.mxu1 %v168_v48  ;;  %vm149_vm6 = vcmp.gt.f32.partialorder %v138_v53, 0.0  ;;  %v819_v48 = vld [vmem:[%s1025_s1 + $0x28] sm:$0xff]  }
  0xea   :  { %vm150_vm7 = vcmp.gt.f32.partialorder %v140_v56, 0.0  ;;  %v158_v60 = vmul.f32 0.01, %v140_v56  ;;  %v164_v62 = vsel %vm148_vm5, %v136_v49, %v156_v55  ;;  %v312_v49 = vpop.permute.xlu0 %311 }
  0xeb   :  { %vm151_vm8 = vcmp.gt.f32.partialorder %v142_v59, 0.0  ;;  %v159_v61 = vmul.f32 0.01, %v142_v59  ;;  %v165_v0 = vsel %vm149_vm6, %v138_v53, %v157_v58  ;;  %v317_v53 = vpop.permute.xlu1 %316 }
  0xec   :  { %v166_v63 = vsel %vm150_vm7, %v140_v56, %v158_v60 }
  0xed   :  { %v167_v1 = vsel %vm151_vm8, %v142_v59, %v159_v61  ;;  %v170_v3 = vpack.c.bf16 %v166_v63, %v164_v62 }
  0xee   :  { %v171_v4 = vpack.c.bf16 %v167_v1, %v165_v0  ;;  %v322_v1 = vpop.permute.xlu0 %321 }
  0xf0   :  { %220 = vmatprep.subr.bf16.mxu1 %v171_v4 }
  0xf1   :  { %221 = vmatpush1.bf16.msra.mxu1 %v170_v3 }
  0xf4   :  { %765 = vmatmul.mubr.msk.bf16.vlgmr.msra.gmra.mrb[0].mxu1 %vm84_vm0, %v816_v5 }
  0xf5   :  { %260 = vmatprep.mubr.bf16.mxu1 %v848_v2 }
  0xfc   :  { %766 = vmatmul.mubr.msk.bf16.gmra.mrb[4].mxu1 %vm84_vm0, %v817_v6 }
  0xfd   :  { %504 = vmatprep.mubr.bf16.mxu1 %v848_v2 }
 0x1c7   :  { %v252_v8 = vpop.f32.mrb[0].mxu1 }
 0x1c8   :  { %v253_v9 = vadd.f32 %v252_v8, %v185_v7  ;;  %v254_v10 = vpop.f32.mrb[1].mxu1 }
 0x1c9   :  { %v255_v12 = vadd.f32 %v254_v10, %v185_v7  ;;  %v256_v13 = vpop.f32.mrb[2].mxu1  ;;  %v327_v10 = vpop.permute.xlu1 %326 }
 0x1ca   :  { %v279_v14 = vmul.f32 0.01, %v253_v9  ;;  %v257_v15 = vadd.f32 %v256_v13, %v190_v11  ;;  %v258_v16 = vpop.f32.mrb[3].mxu1  ;;  %vm271_vm9 = vcmp.gt.f32.partialorder %v253_v9, 0.0 }
 0x1cb   :  { %v280_v17 = vmul.f32 0.01, %v255_v12  ;;  %v259_v18 = vadd.f32 %v258_v16, %v190_v11  ;;  %vm272_vm10 = vcmp.gt.f32.partialorder %v255_v12, 0.0 }
 0x1cc   :  { %vm273_vm11 = vcmp.gt.f32.partialorder %v257_v15, 0.0  ;;  %v281_v19 = vmul.f32 0.01, %v257_v15  ;;  %v287_v21 = vsel %vm271_vm9, %v253_v9, %v279_v14 }
 0x1cd   :  { %vm274_vm12 = vcmp.gt.f32.partialorder %v259_v18, 0.0  ;;  %v282_v20 = vmul.f32 0.01, %v259_v18  ;;  %v288_v26 = vsel %vm272_vm10, %v255_v12, %v280_v17 }
 0x1ce   :  { %v289_v22 = vsel %vm273_vm11, %v257_v15, %v281_v19 }
 0x1cf   :  { %v295_v24 = vpack.c.bf16 %v289_v22, %v287_v21  ;;  %v262_v25 = vpop.f32.mrb[4].mxu1  ;;  %v290_v27 = vsel %vm274_vm12, %v259_v18, %v282_v20 }
 0x1d0   :  { %v263_v28 = vadd.f32 %v262_v25, %v195_v23  ;;  %v264_v29 = vpop.f32.mrb[5].mxu1  ;;  %v296_v30 = vpack.c.bf16 %v290_v27, %v288_v26  ;;  %v820_v26 = vld [vmem:[%s1025_s1 + $0x30] sm:$0xff]   ;;  %v821_v27 = vld [vmem:[%s1025_s1 + $0x38] sm:$0xff]  }
 0x1d1   :  { %v265_v32 = vadd.f32 %v264_v29, %v195_v23  ;;  %v266_v33 = vpop.f32.mrb[6].mxu1 }
 0x1d2   :  { %v283_v34 = vmul.f32 0.01, %v263_v28  ;;  %v267_v35 = vadd.f32 %v266_v33, %v200_v31  ;;  %v268_v36 = vpop.f32.mrb[7].mxu1  ;;  %345 = vmatprep.subr.bf16.mxu0 %v296_v30  ;;  %vm275_vm13 = vcmp.gt.f32.partialorder %v263_v28, 0.0 }
 0x1d3   :  { %v284_v37 = vmul.f32 0.01, %v265_v32  ;;  %v269_v38 = vadd.f32 %v268_v36, %v200_v31  ;;  %346 = vmatpush1.bf16.msra.mxu0 %v295_v24  ;;  %vm276_vm14 = vcmp.gt.f32.partialorder %v265_v32, 0.0 }
 0x1d4   :  { %vm277_vm15 = vcmp.gt.f32.partialorder %v267_v35, 0.0  ;;  %v285_v39 = vmul.f32 0.01, %v267_v35  ;;  %v291_v41 = vsel %vm275_vm13, %v263_v28, %v283_v34  ;;  %v439_v28 = vpop.permute.xlu0 %438 }
 0x1d5   :  { %vm278_vm1 = vcmp.gt.f32.partialorder %v269_v38, 0.0  ;;  %v286_v40 = vmul.f32 0.01, %v269_v38  ;;  %v292_v44 = vsel %vm276_vm14, %v265_v32, %v284_v37  ;;  %v444_v32 = vpop.permute.xlu1 %443 }
 0x1d6   :  { %v293_v42 = vsel %vm277_vm15, %v267_v35, %v285_v39 }
 0x1d7   :  { %v297_v43 = vpack.c.bf16 %v293_v42, %v291_v41  ;;  %v294_v45 = vsel %vm278_vm1, %v269_v38, %v286_v40 }
 0x1d8   :  { %v298_v46 = vpack.c.bf16 %v294_v45, %v292_v44  ;;  %v449_v44 = vpop.permute.xlu0 %448 }
 0x1da   :  { %347 = vmatprep.subr.bf16.mxu0 %v298_v46 }
 0x1db   :  { %348 = vmatpush1.bf16.msra.mxu0 %v297_v43 }
 0x1de   :  { %777 = vmatmul.mubr.msk.bf16.vlgmr.msra.gmra.mrb[8].mxu0 %vm84_vm0, %v818_v47 }
 0x1df   :  { %387 = vmatprep.mubr.bf16.mxu0 %v848_v2 }
 0x1e6   :  { %778 = vmatmul.mubr.msk.bf16.gmra.mrb[12].mxu0 %vm84_vm0, %v819_v48 }
 0x1e7   :  { %631 = vmatprep.mubr.bf16.mxu0 %v848_v2 }
 0x2b1   :  { %v379_v50 = vpop.f32.mrb[8].mxu0 }
 0x2b2   :  { %v380_v51 = vadd.f32 %v379_v50, %v312_v49  ;;  %v381_v52 = vpop.f32.mrb[9].mxu0 }
 0x2b3   :  { %v382_v54 = vadd.f32 %v381_v52, %v312_v49  ;;  %v383_v55 = vpop.f32.mrb[10].mxu0  ;;  %v454_v52 = vpop.permute.xlu1 %453 }
 0x2b4   :  { %v406_v56 = vmul.f32 0.01, %v380_v51  ;;  %v384_v57 = vadd.f32 %v383_v55, %v317_v53  ;;  %v385_v58 = vpop.f32.mrb[11].mxu0  ;;  %vm398_vm2 = vcmp.gt.f32.partialorder %v380_v51, 0.0 }
 0x2b5   :  { %v407_v59 = vmul.f32 0.01, %v382_v54  ;;  %v386_v60 = vadd.f32 %v385_v58, %v317_v53  ;;  %vm399_vm3 = vcmp.gt.f32.partialorder %v382_v54, 0.0 }
 0x2b6   :  { %vm400_vm4 = vcmp.gt.f32.partialorder %v384_v57, 0.0  ;;  %v408_v61 = vmul.f32 0.01, %v384_v57  ;;  %v414_v63 = vsel %vm398_vm2, %v380_v51, %v406_v56 }
 0x2b7   :  { %vm401_vm5 = vcmp.gt.f32.partialorder %v386_v60, 0.0  ;;  %v409_v62 = vmul.f32 0.01, %v386_v60  ;;  %v415_v5 = vsel %vm399_vm3, %v382_v54, %v407_v59 }
 0x2b8   :  { %v416_v0 = vsel %vm400_vm4, %v384_v57, %v408_v61 }
 0x2b9   :  { %v422_v3 = vpack.c.bf16 %v416_v0, %v414_v63  ;;  %v389_v4 = vpop.f32.mrb[12].mxu0  ;;  %v417_v6 = vsel %vm401_vm5, %v386_v60, %v409_v62 }
 0x2ba   :  { %v390_v7 = vadd.f32 %v389_v4, %v322_v1  ;;  %v391_v8 = vpop.f32.mrb[13].mxu0  ;;  %v423_v9 = vpack.c.bf16 %v417_v6, %v415_v5  ;;  %v822_v5 = vld [vmem:[%s1025_s1 + $0x40] sm:$0xff]   ;;  %v823_v6 = vld [vmem:[%s1025_s1 + $0x48] sm:$0xff]  }
 0x2bb   :  { %v392_v11 = vadd.f32 %v391_v8, %v322_v1  ;;  %v393_v12 = vpop.f32.mrb[14].mxu0 }
 0x2bc   :  { %v410_v13 = vmul.f32 0.01, %v390_v7  ;;  %v394_v14 = vadd.f32 %v393_v12, %v327_v10  ;;  %v395_v15 = vpop.f32.mrb[15].mxu0  ;;  %472 = vmatprep.subr.bf16.mxu1 %v423_v9  ;;  %vm402_vm6 = vcmp.gt.f32.partialorder %v390_v7, 0.0 }
 0x2bd   :  { %v411_v16 = vmul.f32 0.01, %v392_v11  ;;  %v396_v17 = vadd.f32 %v395_v15, %v327_v10  ;;  %473 = vmatpush1.bf16.msra.mxu1 %v422_v3  ;;  %vm403_vm7 = vcmp.gt.f32.partialorder %v392_v11, 0.0 }
 0x2be   :  { %vm404_vm8 = vcmp.gt.f32.partialorder %v394_v14, 0.0  ;;  %v412_v18 = vmul.f32 0.01, %v394_v14  ;;  %v418_v20 = vsel %vm402_vm6, %v390_v7, %v410_v13  ;;  %v566_v7 = vpop.permute.xlu0 %565 }
 0x2bf   :  { %vm405_vm9 = vcmp.gt.f32.partialorder %v396_v17, 0.0  ;;  %v413_v19 = vmul.f32 0.01, %v396_v17  ;;  %v419_v23 = vsel %vm403_vm7, %v392_v11, %v411_v16  ;;  %v571_v11 = vpop.permute.xlu1 %570 }
 0x2c0   :  { %v420_v21 = vsel %vm404_vm8, %v394_v14, %v412_v18 }
 0x2c1   :  { %v424_v22 = vpack.c.bf16 %v420_v21, %v418_v20  ;;  %v421_v24 = vsel %vm405_vm9, %v396_v17, %v413_v19 }
 0x2c2   :  { %v425_v25 = vpack.c.bf16 %v421_v24, %v419_v23 }
 0x2c4   :  { %474 = vmatprep.subr.bf16.mxu1 %v425_v25 }
 0x2c5   :  { %475 = vmatpush1.bf16.msra.mxu1 %v424_v22  ;;  %v576_v22 = vpop.permute.xlu0 %575 }
 0x2c8   :  { %789 = vmatmul.mubr.msk.bf16.vlgmr.msra.gmra.mrb[8].mxu1 %vm84_vm0, %v820_v26 }
 0x2c9   :  { %514 = vmatprep.mubr.bf16.mxu1 %v848_v2 }
 0x2d0   :  { %790 = vmatmul.mubr.msk.bf16.gmra.mrb[12].mxu1 %vm84_vm0, %v821_v27 }
 0x2d1   :  { %722 = vmatprep.mubr.bf16.mxu1 %v848_v2 }
 0x39b   :  { %v506_v29 = vpop.f32.mrb[8].mxu1 }
 0x39c   :  { %v507_v30 = vadd.f32 %v506_v29, %v439_v28  ;;  %v508_v31 = vpop.f32.mrb[9].mxu1 }
 0x39d   :  { %v509_v33 = vadd.f32 %v508_v31, %v439_v28  ;;  %v510_v34 = vpop.f32.mrb[10].mxu1 }
 0x39e   :  { %v533_v35 = vmul.f32 0.01, %v507_v30  ;;  %v511_v36 = vadd.f32 %v510_v34, %v444_v32  ;;  %v512_v37 = vpop.f32.mrb[11].mxu1  ;;  %vm525_vm10 = vcmp.gt.f32.partialorder %v507_v30, 0.0 }
 0x39f   :  { %v534_v38 = vmul.f32 0.01, %v509_v33  ;;  %v513_v39 = vadd.f32 %v512_v37, %v444_v32  ;;  %vm526_vm11 = vcmp.gt.f32.partialorder %v509_v33, 0.0 }
 0x3a0   :  { %vm527_vm12 = vcmp.gt.f32.partialorder %v511_v36, 0.0  ;;  %v535_v40 = vmul.f32 0.01, %v511_v36  ;;  %v541_v42 = vsel %vm525_vm10, %v507_v30, %v533_v35  ;;  %v581_v30 = vpop.permute.xlu1 %580 }
 0x3a1   :  { %vm528_vm13 = vcmp.gt.f32.partialorder %v513_v39, 0.0  ;;  %v536_v41 = vmul.f32 0.01, %v513_v39  ;;  %v542_v47 = vsel %vm526_vm11, %v509_v33, %v534_v38 }
 0x3a2   :  { %v543_v43 = vsel %vm527_vm12, %v511_v36, %v535_v40 }
 0x3a3   :  { %v549_v45 = vpack.c.bf16 %v543_v43, %v541_v42  ;;  %v516_v46 = vpop.f32.mrb[12].mxu1  ;;  %v544_v48 = vsel %vm528_vm13, %v513_v39, %v536_v41 }
 0x3a4   :  { %v517_v49 = vadd.f32 %v516_v46, %v449_v44  ;;  %v518_v50 = vpop.f32.mrb[13].mxu1  ;;  %v550_v51 = vpack.c.bf16 %v544_v48, %v542_v47  ;;  %v680_v46 = vld [vmem:[%s1027_s3] sm:$0xf]  ;;  %v685_v47 = vpop.permute.xlu0 %684 }
 0x3a5   :  { %v519_v53 = vadd.f32 %v518_v50, %v449_v44  ;;  %v520_v54 = vpop.f32.mrb[14].mxu1 }
 0x3a6   :  { %v537_v55 = vmul.f32 0.01, %v517_v49  ;;  %v521_v56 = vadd.f32 %v520_v54, %v454_v52  ;;  %v522_v57 = vpop.f32.mrb[15].mxu1  ;;  %599 = vmatprep.subr.bf16.mxu0 %v550_v51  ;;  %vm529_vm14 = vcmp.gt.f32.partialorder %v517_v49, 0.0 }
 0x3a7   :  { %v538_v58 = vmul.f32 0.01, %v519_v53  ;;  %v523_v59 = vadd.f32 %v522_v57, %v454_v52  ;;  %600 = vmatpush1.bf16.msra.mxu0 %v549_v45  ;;  %vm530_vm15 = vcmp.gt.f32.partialorder %v519_v53, 0.0 }
 0x3a8   :  { %vm531_vm1 = vcmp.gt.f32.partialorder %v521_v56, 0.0  ;;  %v539_v60 = vmul.f32 0.01, %v521_v56  ;;  %v545_v62 = vsel %vm529_vm14, %v517_v49, %v537_v55 }
 0x3a9   :  { %vm532_vm2 = vcmp.gt.f32.partialorder %v523_v59, 0.0  ;;  %v540_v61 = vmul.f32 0.01, %v523_v59  ;;  %v546_v1 = vsel %vm530_vm15, %v519_v53, %v538_v58 }
 0x3aa   :  { %v547_v63 = vsel %vm531_vm1, %v521_v56, %v539_v60 }
 0x3ab   :  { %v551_v0 = vpack.c.bf16 %v547_v63, %v545_v62  ;;  %v548_v3 = vsel %vm532_vm2, %v523_v59, %v540_v61 }
 0x3ac   :  { %v552_v4 = vpack.c.bf16 %v548_v3, %v546_v1 }
 0x3ae   :  { %601 = vmatprep.subr.bf16.mxu0 %v552_v4 }
 0x3af   :  { %602 = vmatpush1.bf16.msra.mxu0 %v551_v0 }
 0x3b2   :  { %801 = vmatmul.mubr.msk.bf16.vlgmr.msra.gmra.mrb[16].mxu0 %vm84_vm0, %v822_v5 }
 0x3b3   :  { %641 = vmatprep.mubr.bf16.mxu0 %v848_v2 }
 0x3ba   :  { %802 = vmatmul.mubr.msk.bf16.gmra.mrb[20].mxu0 %vm84_vm0, %v823_v6 }
 0x485   :  { %v633_v8 = vpop.f32.mrb[16].mxu0 }
 0x486   :  { %v634_v9 = vadd.f32 %v633_v8, %v566_v7  ;;  %v635_v10 = vpop.f32.mrb[17].mxu0 }
 0x487   :  { %v636_v12 = vadd.f32 %v635_v10, %v566_v7  ;;  %v637_v13 = vpop.f32.mrb[18].mxu0 }
 0x488   :  { %v660_v14 = vmul.f32 0.01, %v634_v9  ;;  %v638_v15 = vadd.f32 %v637_v13, %v571_v11  ;;  %v639_v16 = vpop.f32.mrb[19].mxu0  ;;  %vm652_vm3 = vcmp.gt.f32.partialorder %v634_v9, 0.0 }
 0x489   :  { %v661_v17 = vmul.f32 0.01, %v636_v12  ;;  %v640_v18 = vadd.f32 %v639_v16, %v571_v11  ;;  %vm653_vm4 = vcmp.gt.f32.partialorder %v636_v12, 0.0 }
 0x48a   :  { %vm654_vm5 = vcmp.gt.f32.partialorder %v638_v15, 0.0  ;;  %v662_v2 = vmul.f32 0.01, %v638_v15  ;;  %v668_v20 = vsel %vm652_vm3, %v634_v9, %v660_v14 }
 0x48b   :  { %vm655_vm6 = vcmp.gt.f32.partialorder %v640_v18, 0.0  ;;  %v663_v19 = vmul.f32 0.01, %v640_v18  ;;  %v669_v25 = vsel %vm653_vm4, %v636_v12, %v661_v17 }
 0x48c   :  { %v670_v21 = vsel %vm654_vm5, %v638_v15, %v662_v2 }
 0x48d   :  { %v676_v23 = vpack.c.bf16 %v670_v21, %v668_v20  ;;  %v643_v24 = vpop.f32.mrb[20].mxu0  ;;  %v671_v26 = vsel %vm655_vm6, %v640_v18, %v663_v19 }
 0x48e   :  { %v644_v27 = vadd.f32 %v643_v24, %v576_v22  ;;  %v645_v28 = vpop.f32.mrb[21].mxu0  ;;  %v677_v29 = vpack.c.bf16 %v671_v26, %v669_v25 }
 0x48f   :  { %v646_v31 = vadd.f32 %v645_v28, %v576_v22  ;;  %v647_v32 = vpop.f32.mrb[22].mxu0 }
 0x490   :  { %v664_v33 = vmul.f32 0.01, %v644_v27  ;;  %v648_v34 = vadd.f32 %v647_v32, %v581_v30  ;;  %v649_v35 = vpop.f32.mrb[23].mxu0  ;;  %690 = vmatprep.subr.bf16.mxu1 %v677_v29  ;;  %vm656_vm7 = vcmp.gt.f32.partialorder %v644_v27, 0.0 }
 0x491   :  { %v665_v36 = vmul.f32 0.01, %v646_v31  ;;  %v650_v37 = vadd.f32 %v649_v35, %v581_v30  ;;  %691 = vmatpush1.bf16.msra.mxu1 %v676_v23  ;;  %vm657_vm8 = vcmp.gt.f32.partialorder %v646_v31, 0.0 }
 0x492   :  { %vm658_vm9 = vcmp.gt.f32.partialorder %v648_v34, 0.0  ;;  %v666_v38 = vmul.f32 0.01, %v648_v34  ;;  %v672_v40 = vsel %vm656_vm7, %v644_v27, %v664_v33 }
 0x493   :  { %vm659_vm10 = vcmp.gt.f32.partialorder %v650_v37, 0.0  ;;  %v667_v39 = vmul.f32 0.01, %v650_v37  ;;  %v673_v43 = vsel %vm657_vm8, %v646_v31, %v665_v36 }
 0x494   :  { %v674_v41 = vsel %vm658_vm9, %v648_v34, %v666_v38 }
 0x495   :  { %v678_v42 = vpack.c.bf16 %v674_v41, %v672_v40  ;;  %v675_v44 = vsel %vm659_vm10, %v650_v37, %v667_v39 }
 0x496   :  { %v679_v45 = vpack.c.bf16 %v675_v44, %v673_v43 }
 0x498   :  { %692 = vmatprep.subr.bf16.mxu1 %v679_v45 }
 0x499   :  { %693 = vmatpush1.bf16.msra.mxu1 %v678_v42 }
 0x49c   :  { %803 = vmatmul.mubr.msk.bf16.vlgmr.msra.gmra.mrb[16].mxu1 %vm84_vm0, %v680_v46 }
 0x56f   :  { %v724_v48 = vpop.f32.mrb[16].mxu1 }
 0x570   :  { %v725_v49 = vadd.f32 %v724_v48, %v685_v47  ;;  %v726_v50 = vpop.f32.mrb[17].mxu1 }
 0x571   :  { %v727_v51 = vadd.f32 %v726_v50, %v685_v47  ;;  %v728_v52 = vpop.f32.mrb[18].mxu1 }
 0x572   :  { %731 = vst [vmem:[#allocation2] sm:$0xff] %v725_v49  ;;  %v729_v53 = vpop.f32.mrb[19].mxu1 }
 0x573   :  { %732 = vst [vmem:[#allocation2 + $0x8] sm:$0xff] %v727_v51 }
 0x574   :  { %835 = shalt.err (!%p832_p4)
}
 0x575   :  { %s836_s13 = scalar_lea.hbm %s1029_s5, 256 }
 0x576   :  { %p837_p5 = scmp.ne.s32.totalorder %s1029_s5, %s836_s13  ;;  %p840_p6 = scmp.lt.u32.totalorder %s836_s13, %s1029_s5 }
 0x578   :  { %p842_p7 = pnand %p840_p6, %p837_p5 }
 0x57a   :  { %845 = shalt.err (!%p842_p7)
}
 0x57b   :  { %742 = dma.vmem_to_hbm [thread:$0]  %s740_s10, 256, %s1029_s5, [#allocation3]  }
 0x57c   :  { %846 = dma.done.wait [#allocation3], 256  }
 0x57d   :  { %847 = vsyncadd [#allocation3], 4294967040 }
 0x57e   :  { %746 = vsyncpa [#allocation3], 1 }

</bundles_post_ra>
